<compile_context>
chip_gen: v7x
topology: tpu7x:2x2x1
jax: 0.10.0
libtpu: 0.0.40
codegen_flags: <defaults>
</compile_context>

<pallas_src>
import jax
import jax.numpy as jnp
from jax.experimental import pallas as pl
from jax.experimental.pallas import tpu as pltpu


def _clip_loss_kernel(scale_ref, img_ref, txt_ref, row_ref, m_ref, s_ref):
    """One batch-row tile of the fused CLIP contrastive loss.

    Emits, per tile:
      row_ref (tb, 1): per-row logsumexp(li) - 2 * diag   (image-direction CE;
          the diagonal/target logit appears once in each CE direction, so it is
          subtracted twice here and the text direction only needs column LSEs)
      m_ref / s_ref (1, 8, B): column-wise (max, sum(exp(li - max))) partials of
          li; since logits_per_text == li.T these reconstruct the text-direction
          logsumexp in the wrapper.  All tiles are independent -> parallel grid.
    """
    tb = row_ref.shape[0]
    i = pl.program_id(0)
    scale = scale_ref[0]                       # SMEM scalar (temperature / logit scale)
    r0 = pl.multiple_of(i * tb, tb)            # global first row of this tile

    img_tile = img_ref[pl.ds(r0, tb), :]       # (tb, D), native dtype
    txt_tile = txt_ref[pl.ds(r0, tb), :]       # (tb, D), native dtype

    # Fold the logit scale into the small LHS tile: O(tb*D) instead of O(tb*B).
    lhs = (img_tile.astype(jnp.float32) * scale).astype(img_ref.dtype)

    # MXU matmul contracting on the last dims (no materialized txt.T, no
    # per-step cast of the resident matrices), f32 accumulation.
    li = jax.lax.dot_general(
        lhs, txt_ref[...],
        dimension_numbers=(((1,), (1,)), ((), ())),
        preferred_element_type=jnp.float32)    # (tb, B)

    # Labels are arange(B): the target logit of global row g is column g, i.e.
    # the diagonal, computed directly from the feature tiles (O(tb*D) VPU work,
    # no iota/compare/select).  diag(logits_per_text) is identical.
    diag = scale * jnp.sum(
        img_tile.astype(jnp.float32) * txt_tile.astype(jnp.float32),
        axis=-1, keepdims=True)                # (tb, 1)

    # Image direction: per-row numerically-stable logsumexp.
    m_row = jnp.max(li, axis=-1, keepdims=True)
    lse_row = m_row + jnp.log(jnp.sum(jnp.exp(li - m_row), axis=-1, keepdims=True))
    row_ref[...] = lse_row - 2.0 * diag        # (tb, 1)

    # Text direction partials: column-wise logsumexp pieces of li.
    col_max = jnp.max(li, axis=0, keepdims=True)                      # (1, B)
    col_sum = jnp.sum(jnp.exp(li - col_max), axis=0, keepdims=True)   # (1, B)
    # Broadcast over the 8 sublanes so the (1, 8, B) output blocks are written
    # with full, unmasked stores (wrapper reads sublane 0).
    m_ref[...] = jnp.broadcast_to(col_max, m_ref.shape)
    s_ref[...] = jnp.broadcast_to(col_sum, s_ref.shape)


def _pick_row_tile(batch, max_tile=512):
    """Largest divisor of `batch` <= max_tile, preferring MXU-friendly sizes.

    Also bounds the (tb, B) f32 logits/exp temporaries (~3 live copies) to
    ~8 MiB so very large batches do not overflow VMEM (tightest on v7x).
    """
    inter_cap = (8 * 1024 * 1024) // max(1, 12 * batch)
    if inter_cap >= 8:
        max_tile = min(max_tile, (inter_cap // 8) * 8)
    max_tile = max(8, max_tile)
    cands = [t for t in range(1, min(batch, max_tile) + 1) if batch % t == 0]
    for align in (256, 128, 8):
        aligned = [t for t in cands if t % align == 0]
        if aligned:
            return max(aligned)
    # No sublane-aligned divisor (odd/prime batch): one full tile avoids heavily
    # masked row slices when it plausibly fits; otherwise the best divisor.
    return batch if batch <= 4 * max_tile else max(cands)


def _resident_spec(shape):
    """Whole-array VMEM-resident block (constant index map -> fetched once).

    Single-buffered when pipeline_mode is supported: the block never changes,
    so double-buffering only doubles the footprint (matters on v7x's 64 MiB).
    """
    index_map = lambda i: (0, 0)
    try:
        return pl.BlockSpec(shape, index_map, pipeline_mode=pl.Buffered(1))
    except (AttributeError, TypeError):
        return pl.BlockSpec(shape, index_map)


def clip_contrastive_loss(image_features, text_features, logit_scale, *,
                          compute_dtype=None, max_row_tile=512):
    """Pallas fused CLIP contrastive loss (single device, world_size == 1)."""
    if compute_dtype is not None:
        # One-time cast outside the kernel (e.g. bf16 for max MXU throughput on
        # v5e/v6e/v7x); in-kernel accumulation stays f32.
        image_features = image_features.astype(compute_dtype)
        text_features = text_features.astype(compute_dtype)

    B, D = image_features.shape
    assert text_features.shape == (B, D), (text_features.shape, (B, D))

    tb = _pick_row_tile(B, max_row_tile)
    num_tiles = B // tb
    scale = jnp.asarray(logit_scale, jnp.float32).reshape(1)

    itemsize = jnp.dtype(image_features.dtype).itemsize
    try:
        vmem_cap = int(pltpu.get_tpu_info().vmem_capacity_bytes)
    except Exception:
        vmem_cap = 64 * 1024 * 1024            # conservative (v7x per-core VMEM)
    needed = (4 * B * D * itemsize             # residents (worst case 2x-buffered)
              + 8 * tb * B * 4                 # (tb, B) f32 logits/exp temporaries
              + 2 * (tb + 2 * 8 * B) * 4)      # per-tile partial outputs
    vmem_limit = int(min(0.85 * vmem_cap, max(32 * 1024 * 1024, 2 * needed)))

    row_part, m_part, s_part = pl.pallas_call(
        _clip_loss_kernel,
        out_shape=(
            jax.ShapeDtypeStruct((B, 1), jnp.float32),
            jax.ShapeDtypeStruct((num_tiles, 8, B), jnp.float32),
            jax.ShapeDtypeStruct((num_tiles, 8, B), jnp.float32),
        ),
        grid_spec=pltpu.PrefetchScalarGridSpec(
            num_scalar_prefetch=0,
            grid=(num_tiles,),
            in_specs=[
                pl.BlockSpec(memory_space=pltpu.MemorySpace.SMEM),   # logit scale
                _resident_spec((B, D)),                              # image feats (resident)
                _resident_spec((B, D)),                              # text feats  (resident)
            ],
            out_specs=(
                pl.BlockSpec((tb, 1), lambda i: (i, 0)),
                pl.BlockSpec((1, 8, B), lambda i: (i, 0, 0)),
                pl.BlockSpec((1, 8, B), lambda i: (i, 0, 0)),
            ),
        ),
        compiler_params=pltpu.CompilerParams(
            dimension_semantics=("parallel",),     # tiles are independent (megacore OK)
            vmem_limit_bytes=vmem_limit,
        ),
    )(scale, image_features, text_features)

    # Tiny epilogue in XLA: merge per-tile column logsumexp partials (text CE)
    # and sum the per-row contributions (image CE + both diagonals).
    m_part = m_part[:, 0, :]                                # (num_tiles, B)
    s_part = s_part[:, 0, :]
    m_glob = jnp.max(m_part, axis=0)                        # (B,)
    col_lse = m_glob + jnp.log(jnp.sum(s_part * jnp.exp(m_part - m_glob), axis=0))
    total = (jnp.sum(row_part) + jnp.sum(col_lse)) * (0.5 / B)
    return total


class ClipLoss:
    """JAX/Pallas equivalent of the single-device PyTorch ClipLoss."""

    def __init__(self, local_loss=False, gather_with_grad=False, cache_labels=False,
                 rank=0, world_size=1, use_horovod=False):
        assert world_size == 1, "distributed gather_features path not implemented"
        self.world_size = world_size

    def __call__(self, image_features, text_features, logit_scale, output_dict=False):
        total_loss = clip_contrastive_loss(image_features, text_features, logit_scale)
        return {'contrastive_loss': total_loss} if output_dict else total_loss


class OriginalCLIPLossWrapper:
    """JAX/Pallas equivalent of the PyTorch OriginalCLIPLossWrapper module."""

    def __init__(self):
        self.loss = ClipLoss()

    def forward(self, image_embeddings, text_embeddings, label_embeddings,
                dot_similarity, label_one_hot, temperature, mode):
        # label_embeddings / dot_similarity / label_one_hot / mode are ignored,
        # exactly as in the reference module.
        return self.loss(image_embeddings, text_embeddings, temperature)

    __call__ = forward


def _clip_loss_ref(img, txt, scale):
    """Pure-JAX reference mirroring ClipLoss.forward (world_size == 1)."""
    img = img.astype(jnp.float32)
    txt = txt.astype(jnp.float32)
    li = scale * img @ txt.T
    lt = scale * txt @ img.T
    B = img.shape[0]
    idx = jnp.arange(B)
    ce_i = jnp.mean(jax.nn.logsumexp(li, axis=-1) - li[idx, idx])
    ce_t = jnp.mean(jax.nn.logsumexp(lt, axis=-1) - lt[idx, idx])
    return 0.5 * (ce_i + ce_t)


if __name__ == "__main__":
    key = jax.random.PRNGKey(0)
    k1, k2, k3, k4, k5 = jax.random.split(key, 5)

    B, D, L = 16, 32, 12          # batch, embedding dim, num labels (labels unused)

    def l2norm(x):
        return x / jnp.linalg.norm(x, axis=-1, keepdims=True)

    image_embeddings = l2norm(jax.random.normal(k1, (B, D), jnp.float32))
    text_embeddings = l2norm(jax.random.normal(k2, (B, D), jnp.float32))
    label_embeddings = jax.random.normal(k3, (L, D), jnp.float32)     # unused by forward
    dot_similarity = jax.random.normal(k4, (B, L), jnp.float32)       # unused by forward
    label_one_hot = (jax.random.uniform(k5, (B, L)) < 0.1).astype(jnp.float32)  # unused
    temperature = jnp.float32(1.0 / 0.07)   # passed in the logit_scale slot, as in the module

    wrapper = OriginalCLIPLossWrapper()
    loss = wrapper(image_embeddings, text_embeddings, label_embeddings,
                   dot_similarity, label_one_hot, temperature, 'train')
    jax.block_until_ready(loss)

    ref = _clip_loss_ref(image_embeddings, text_embeddings, temperature)
    assert jnp.allclose(loss, ref, rtol=1e-4, atol=1e-4), (loss, ref)

    print("KERNEL_OK")
</pallas_src>

<mosaic_0001>
module attributes {stable_mosaic.version = 11 : i64} {
  func.func @_clip_loss_kernel(%arg0: i32, %arg1: memref<1xf32, #tpu.memory_space<smem>>, %arg2: memref<16x32xf32, #tpu.memory_space<vmem>>, %arg3: memref<16x32xf32, #tpu.memory_space<vmem>>, %arg4: memref<16x1xf32, #tpu.memory_space<vmem>>, %arg5: memref<1x8x16xf32, #tpu.memory_space<vmem>>, %arg6: memref<1x8x16xf32, #tpu.memory_space<vmem>>) attributes {dimension_semantics = [#tpu.dimension_semantics<parallel>], iteration_bounds = array<i64: 1>, scalar_prefetch = 0 : i64, scratch_operands = 0 : i64, tpu.core_type = #tpu.core_type<tc>, window_params = [{transform_indices = @transform_0, window_bounds = array<i64: 1>}, {pipeline_mode = #tpu.pipeline_mode<synchronous>, transform_indices = @transform_1, window_bounds = array<i64: 16, 32>}, {pipeline_mode = #tpu.pipeline_mode<synchronous>, transform_indices = @transform_2, window_bounds = array<i64: 16, 32>}, {transform_indices = @transform_3, window_bounds = array<i64: 16, 1>}, {transform_indices = @transform_4, window_bounds = array<i64: 1, 8, 16>}, {transform_indices = @transform_5, window_bounds = array<i64: 1, 8, 16>}]} {
    %c0 = arith.constant 0 : index
    %0 = memref.load %arg1[%c0] : memref<1xf32, #tpu.memory_space<smem>>
    %c16_i32 = arith.constant 16 : i32
    %1 = arith.muli %arg0, %c16_i32 : i32
    %2 = tpu.assume_multiple %1, 16 : i32
    %3 = arith.index_cast %2 : i32 to index
    %c0_0 = arith.constant 0 : index
    %4 = vector.load %arg2[%3, %c0_0] : memref<16x32xf32, #tpu.memory_space<vmem>>, vector<16x32xf32>
    %5 = arith.index_cast %2 : i32 to index
    %c0_1 = arith.constant 0 : index
    %6 = vector.load %arg3[%5, %c0_1] : memref<16x32xf32, #tpu.memory_space<vmem>>, vector<16x32xf32>
    %7 = vector.broadcast %0 : f32 to vector<16x32xf32>
    %8 = arith.mulf %4, %7 : vector<16x32xf32>
    %c0_2 = arith.constant 0 : index
    %c0_3 = arith.constant 0 : index
    %9 = vector.load %arg3[%c0_2, %c0_3] : memref<16x32xf32, #tpu.memory_space<vmem>>, vector<16x32xf32>
    %cst = arith.constant dense<0.000000e+00> : vector<16x16xf32>
    %10 = tpu.matmul %8, %9, %cst {dimension_numbers = #tpu.dot_dimension_numbers<[1], [1], [0], [0], [0, 0, 1, 0], [], []>} : vector<16x32xf32>, vector<16x32xf32>, vector<16x16xf32> -> vector<16x16xf32>
    %11 = arith.mulf %4, %6 : vector<16x32xf32>
    %cst_4 = arith.constant dense<0.000000e+00> : vector<16xf32>
    %12 = vector.multi_reduction <add>, %11, %cst_4 [1] : vector<16x32xf32> to vector<16xf32>
    %13 = vector.shape_cast %12 : vector<16xf32> to vector<16x1xf32>
    %14 = vector.broadcast %0 : f32 to vector<16x1xf32>
    %15 = arith.mulf %14, %13 : vector<16x1xf32>
    %cst_5 = arith.constant dense<0xFF800000> : vector<16xf32>
    %16 = vector.multi_reduction <maximumf>, %10, %cst_5 [1] : vector<16x16xf32> to vector<16xf32>
    %17 = vector.shape_cast %16 : vector<16xf32> to vector<16x1xf32>
    %18 = vector.broadcast %17 : vector<16x1xf32> to vector<16x16xf32>
    %19 = arith.subf %10, %18 : vector<16x16xf32>
    %20 = math.exp %19 : vector<16x16xf32>
    %cst_6 = arith.constant dense<0.000000e+00> : vector<16xf32>
    %21 = vector.multi_reduction <add>, %20, %cst_6 [1] : vector<16x16xf32> to vector<16xf32>
    %22 = vector.shape_cast %21 : vector<16xf32> to vector<16x1xf32>
    %23 = math.log %22 : vector<16x1xf32>
    %24 = arith.addf %17, %23 : vector<16x1xf32>
    %cst_7 = arith.constant 2.000000e+00 : f32
    %25 = vector.broadcast %cst_7 : f32 to vector<16x1xf32>
    %26 = arith.mulf %25, %15 : vector<16x1xf32>
    %27 = arith.subf %24, %26 : vector<16x1xf32>
    %c0_8 = arith.constant 0 : index
    %c0_9 = arith.constant 0 : index
    %28 = vector.load %arg4[%c0_8, %c0_9] : memref<16x1xf32, #tpu.memory_space<vmem>>, vector<16x1xf32>
    tpu.vector_store %arg4[%c0_8, %c0_9], %27 {strides = array<i32>} : memref<16x1xf32, #tpu.memory_space<vmem>>, vector<16x1xf32>,
    %cst_10 = arith.constant dense<0xFF800000> : vector<16xf32>
    %29 = vector.multi_reduction <maximumf>, %10, %cst_10 [0] : vector<16x16xf32> to vector<16xf32>
    %30 = vector.shape_cast %29 : vector<16xf32> to vector<1x16xf32>
    %31 = vector.broadcast %30 : vector<1x16xf32> to vector<16x16xf32>
    %32 = arith.subf %10, %31 : vector<16x16xf32>
    %33 = math.exp %32 : vector<16x16xf32>
    %cst_11 = arith.constant dense<0.000000e+00> : vector<16xf32>
    %34 = vector.multi_reduction <add>, %33, %cst_11 [0] : vector<16x16xf32> to vector<16xf32>
    %35 = vector.shape_cast %34 : vector<16xf32> to vector<1x16xf32>
    %36 = vector.shape_cast %30 : vector<1x16xf32> to vector<1x1x16xf32>
    %37 = vector.broadcast %36 : vector<1x1x16xf32> to vector<1x8x16xf32>
    %c0_12 = arith.constant 0 : index
    %c0_13 = arith.constant 0 : index
    %c0_14 = arith.constant 0 : index
    %38 = vector.load %arg5[%c0_12, %c0_13, %c0_14] : memref<1x8x16xf32, #tpu.memory_space<vmem>>, vector<1x8x16xf32>
    tpu.vector_store %arg5[%c0_12, %c0_13, %c0_14], %37 {strides = array<i32>} : memref<1x8x16xf32, #tpu.memory_space<vmem>>, vector<1x8x16xf32>,
    %39 = vector.shape_cast %35 : vector<1x16xf32> to vector<1x1x16xf32>
    %40 = vector.broadcast %39 : vector<1x1x16xf32> to vector<1x8x16xf32>
    %c0_15 = arith.constant 0 : index
    %c0_16 = arith.constant 0 : index
    %c0_17 = arith.constant 0 : index
    %41 = vector.load %arg6[%c0_15, %c0_16, %c0_17] : memref<1x8x16xf32, #tpu.memory_space<vmem>>, vector<1x8x16xf32>
    tpu.vector_store %arg6[%c0_15, %c0_16, %c0_17], %40 {strides = array<i32>} : memref<1x8x16xf32, #tpu.memory_space<vmem>>, vector<1x8x16xf32>,
    return
  }
  func.func @transform_0(%arg0: i32) -> i32 {
    %c0_i32 = arith.constant 0 : i32
    %c0_i32_0 = arith.constant 0 : i32
    return %c0_i32 : i32
  }
  func.func @transform_1(%arg0: i32) -> (i32, i32) {
    %c0_i32 = arith.constant 0 : i32
    %c0_i32_0 = arith.constant 0 : i32
    %c0_i32_1 = arith.constant 0 : i32
    return %c0_i32, %c0_i32_0 : i32, i32
  }
  func.func @transform_2(%arg0: i32) -> (i32, i32) {
    %c0_i32 = arith.constant 0 : i32
    %c0_i32_0 = arith.constant 0 : i32
    %c0_i32_1 = arith.constant 0 : i32
    return %c0_i32, %c0_i32_0 : i32, i32
  }
  func.func @transform_3(%arg0: i32) -> (i32, i32) {
    %c0_i32 = arith.constant 0 : i32
    %c0_i32_0 = arith.constant 0 : i32
    return %arg0, %c0_i32 : i32, i32
  }
  func.func @transform_4(%arg0: i32) -> (i32, i32, i32) {
    %c0_i32 = arith.constant 0 : i32
    %c0_i32_0 = arith.constant 0 : i32
    %c0_i32_1 = arith.constant 0 : i32
    return %arg0, %c0_i32, %c0_i32_0 : i32, i32, i32
  }
  func.func @transform_5(%arg0: i32) -> (i32, i32, i32) {
    %c0_i32 = arith.constant 0 : i32
    %c0_i32_0 = arith.constant 0 : i32
    %c0_i32_1 = arith.constant 0 : i32
    return %arg0, %c0_i32, %c0_i32_0 : i32, i32, i32
  }
}

</mosaic_0001>

<bundles_post_ra>
// kernel: tpu_custom_call.1
= control target key start
LH: loop header
LB: loop body
LE: loop exit
PB: predicated region body
PF: predicated region fallthrough
CT: control target
= control target key end

     0   :  { %12 = vsyncpa [#allocation4], 0  ;;  %s501_s0 = inlined_call_operand.<no memory space> [shape: f32[1], index: 0, kind: input, shape index: {}]   ;;  %s502_s1 = inlined_call_operand.hbm [shape: f32[16,32], index: 1, kind: input, shape index: {}]   ;;  %s503_s2 = inlined_call_operand.hbm [shape: f32[16,32], index: 2, kind: input, shape index: {}]   ;;  %s504_s3 = inlined_call_operand.vmem [shape: f32[16,1], index: 3, kind: output, shape index: {0}]   ;;  %s505_s4 = inlined_call_operand.hbm [shape: f32[1,8,16], index: 4, kind: output, shape index: {1}]   ;;  %s506_s5 = inlined_call_operand.hbm [shape: f32[1,8,16], index: 5, kind: output, shape index: {2}]  }
   0x1   :  { %13 = vsyncpa [#allocation7], 0 }
   0x2   :  { %14 = vsyncpa [#allocation5], 0 }
   0x3   :  { %15 = vsyncpa [#allocation10], 0  ;;  %s384_s18 = smov [#allocation3]   ;;  %s288_s22 = scalar_lea.hbm %s502_s1, 256 }
   0x4   :  { %s23_s19 = sshll.u32 %s384_s18, 4  ;;  %p289_p0 = scmp.ne.s32.totalorder %s502_s1, %s288_s22  ;;  %s24_s19 = int_to_ptr.vmem [resolvable:$true] %s23_s19 }
   0x5   :  { %p292_p1 = scmp.lt.u32.totalorder %s288_s22, %s502_s1 }
   0x7   :  { %p294_p2 = pnand %p292_p1, %p289_p0 }
   0x9   :  { %297 = shalt.err (!%p294_p2)
}
   0xa   :  { %s298_s27 = scalar_lea.vmem %s24_s19, 256  ;;  %p303_p4 = scmp.lt.s32.totalorder %s24_s19, %s24_s19 }
   0xb   :  { %p299_p3 = scmp.ne.s32.totalorder %s24_s19, %s298_s27  ;;  %p304_p5 = scmp.lt.s32.totalorder %s298_s27, %s298_s27 }
   0xd   :  { %p305_p6 = por %p304_p5, %p303_p4 }
   0xf   :  { %p306_p7 = pnand %p305_p6, %p299_p3 }
  0x11   :  { %309 = shalt.err (!%p306_p7)
}
  0x12   :  { %s385_s28 = smov 128   ;;  %s386_s29 = smov 8  }
  0x13   :  { %29 = dma.hbm_to_vmem [thread:$0]  %s502_s1, 256, %s24_s19, [#allocation4], %s385_s28, %s385_s28, %s386_s29  }
  0x14   :  { %s387_s7 = smov [#allocation6]   ;;  %s310_s11 = scalar_lea.hbm %s503_s2, 256 }
  0x15   :  { %s35_s8 = sshll.u32 %s387_s7, 4  ;;  %p311_p8 = scmp.ne.s32.totalorder %s503_s2, %s310_s11  ;;  %s36_s8 = int_to_ptr.vmem [resolvable:$true] %s35_s8 }
  0x16   :  { %p314_p9 = scmp.lt.u32.totalorder %s310_s11, %s503_s2 }
  0x18   :  { %p316_p10 = pnand %p314_p9, %p311_p8 }
  0x1a   :  { %319 = shalt.err (!%p316_p10)
}
  0x1b   :  { %s320_s16 = scalar_lea.vmem %s36_s8, 256  ;;  %p325_p12 = scmp.lt.s32.totalorder %s36_s8, %s36_s8 }
  0x1c   :  { %p321_p11 = scmp.ne.s32.totalorder %s36_s8, %s320_s16  ;;  %p326_p13 = scmp.lt.s32.totalorder %s320_s16, %s320_s16 }
  0x1e   :  { %p327_p0 = por %p326_p13, %p325_p12 }
  0x20   :  { %p328_p1 = pnand %p327_p0, %p321_p11 }
  0x22   :  { %331 = shalt.err (!%p328_p1)
}
  0x23   :  { %41 = dma.hbm_to_vmem [thread:$0]  %s503_s2, 256, %s36_s8, [#allocation7], %s385_s28, %s385_s28, %s386_s29  }
  0x24   :  { %376 = dma.done.wait [#allocation4], 256  }
  0x25   :  { %377 = vsyncadd [#allocation4], 4294967040 }
  0x26   :  { %378 = dma.done.wait [#allocation7], 256  }
  0x27   :  { %379 = vsyncadd [#allocation7], 4294967040  ;;  %vm61_vm0 = vcmask 261120   ;;  %v447_v0 = vstv %s501_s0  ;;  %v59_v1 = vld [vmem:[#allocation6] sm:$0xff]  ;;  %v60_v2 = vld [vmem:[#allocation6 + $0x8] sm:$0xff]  ;;  %vm159_vm2 = vcmask 130048  }
  0x28   :  { %vm265_vm1 = vmpackc.low %vm61_vm0, %vm61_vm0  ;;  %v51_v3 = vld [vmem:[#allocation3] sm:$0xff]  ;;  %v264_v4 = vpack.c.bf16 %v60_v2, %v59_v1  ;;  %v52_v6 = vld [vmem:[#allocation3 + $0x8] sm:$0xff]  ;;  %s388_s0 = smov [#allocation8]   ;;  %s389_s20 = smov [#allocation9]  }
  0x29   :  { %v57_v5 = vmul.f32 %v447_v0, %v51_v3  ;;  %v58_v7 = vmul.f32 %v447_v0, %v52_v6  ;;  %v149_v29 = vmul.f32 %v59_v1, %v51_v3  ;;  %v150_v44 = vmul.f32 %v60_v2, %v52_v6  ;;  %s223_s2 = sshll.u32 %s388_s0, 4  ;;  %s233_s21 = sshll.u32 %s389_s20, 4  ;;  %s224_s2 = int_to_ptr.vmem [resolvable:$true] %s223_s2  ;;  %s234_s21 = int_to_ptr.vmem [resolvable:$true] %s233_s21 }
  0x2a   :  { %266 = vmatprep.subr.msk.bf16.mxu0 %vm265_vm1, %v264_v4  ;;  %s332_s22 = scalar_lea.vmem %s224_s2, 128  ;;  %p337_p3 = scmp.lt.s32.totalorder %s224_s2, %s224_s2 }
  0x2b   :  { %261 = vmatprep.mubr.msk.f32.mxu0 %vm61_vm0, %v57_v5  ;;  %269 = vmatpush3.bf16.xpose.msk.msra.mxu0 %vm265_vm1, %v264_v4  ;;  %v151_v31 = vsel %vm61_vm0, %v149_v29, 0.0  ;;  %v154_v47 = vsel %vm61_vm0, %v150_v44, 0.0  ;;  %p333_p2 = scmp.ne.s32.totalorder %s224_s2, %s332_s22  ;;  %p338_p4 = scmp.lt.s32.totalorder %s332_s22, %s332_s22 }
  0x2d   :  { %p339_p5 = por %p338_p4, %p337_p3 }
  0x2f   :  { %p340_p6 = pnand %p339_p5, %p333_p2 }
  0x32   :  { %262 = vmatmul.mubr.msk.f32.vlgmr.msra.gmra.mrb[0].mxu0 %vm61_vm0, %v58_v7 }
 0x105   :  { %v263_v8 = vpop.f32.mrb[0].mxu0 }
 0x106   :  { %v140_v9 = vpop.f32.mrb[1].mxu0  ;;  %v163_v10 = vsel %vm159_vm2, %v263_v8, -inf }
 0x107   :  { %v160_v11 = vsel %vm159_vm2, %v140_v9, -inf }
 0x108   :  { %161 = vmax.xlane.f32.xlu0 %v160_v11  ;;  %v191_v12 = vmax.f32 %v160_v11, %v163_v10 }
 0x10a   :  { %v192_v13 = vrot.slane %v191_v12, 4 }
 0x10c   :  { %164 = vmax.xlane.f32.xlu0 %v163_v10  ;;  %v193_v14 = vmax.f32 %v191_v12, %v192_v13 }
 0x10e   :  { %v194_v15 = vrot.slane %v193_v14, 2 }
 0x110   :  { %v195_v16 = vmax.f32 %v193_v14, %v194_v15  ;;  %152 = vadd.xlane.f32.xlu0 %v151_v31 }
 0x112   :  { %v196_v17 = vrot.slane %v195_v16, 1 }
 0x114   :  { %v197_v18 = vmax.f32 %v195_v16, %v196_v17 }
 0x116   :  { %v198_v19 = vsub.f32 %v140_v9, %v197_v18  ;;  %v199_v20 = vsub.f32 %v263_v8, %v197_v18  ;;  %213 = vst.msk [vmem:[#allocation8] sm:$0xff] %vm159_vm2, %v197_v18 }
 0x118   :  { %v200_v21 = vmul.f32 1.442695, %v198_v19  ;;  %v202_v22 = vmul.f32 1.442695, %v199_v20 }
 0x11a   :  { %276 = vpow2.f32 %v200_v21 }
 0x11b   :  { %278 = vpow2.f32 %v202_v22 }
 0x124   :  { %v277_v23 = vpop.eup %276 }
 0x125   :  { %v279_v24 = vpop.eup %278  ;;  %v204_v25 = vsel %vm159_vm2, %v277_v23, 0.0 }
 0x126   :  { %v205_v26 = vsel %vm159_vm2, %v279_v24, 0.0 }
 0x127   :  { %v206_v27 = vadd.f32 %v205_v26, %v204_v25 }
 0x129   :  { %v207_v28 = vrot.slane %v206_v27, 4 }
 0x12b   :  { %v208_v30 = vadd.f32 %v207_v28, %v206_v27 }
 0x12d   :  { %v209_v32 = vrot.slane %v208_v30, 2 }
 0x12f   :  { %v210_v33 = vadd.f32 %v209_v32, %v208_v30 }
 0x131   :  { %v211_v34 = vrot.slane %v210_v33, 1 }
 0x133   :  { %v212_v35 = vadd.f32 %v211_v34, %v210_v33 }
 0x135   :  { %214 = vst.msk [vmem:[#allocation9] sm:$0xff] %vm159_vm2, %v212_v35 }
 0x195   :  { %v162_v36 = vpop.xlane.xlu0 %161 }
 0x196   :  { %v166_v37 = vsub.f32 %v140_v9, %v162_v36 }
 0x198   :  { %v168_v38 = vmul.f32 1.442695, %v166_v37 }
 0x199   :  { %v462_v39 = vpop.xlane.xlu0 %164 }
 0x19a   :  { %280 = vpow2.f32 %v168_v38  ;;  %v167_v40 = vsub.f32 %v263_v8, %v462_v39 }
 0x19c   :  { %v170_v41 = vmul.f32 1.442695, %v167_v40 }
 0x19e   :  { %282 = vpow2.f32 %v170_v41 }
 0x1a4   :  { %v281_v42 = vpop.eup %280 }
 0x1a5   :  { %v172_v43 = vsel %vm159_vm2, %v281_v42, 0.0 }
 0x1a6   :  { %173 = vadd.xlane.f32.xlu1 %v172_v43 }
 0x1a8   :  { %v283_v45 = vpop.eup %282 }
 0x1a9   :  { %v175_v46 = vsel %vm159_vm2, %v283_v45, 0.0 }
 0x1aa   :  { %176 = vadd.xlane.f32.xlu1 %v175_v46 }
 0x1ae   :  { %155 = vadd.xlane.f32.xlu1 %v154_v47 }
 0x1af   :  { %343 = shalt.err (!%p340_p6)
}
 0x1b0   :  { %s344_s25 = scalar_lea.hbm %s505_s4, 128 }
 0x1b1   :  { %p345_p7 = scmp.ne.s32.totalorder %s505_s4, %s344_s25  ;;  %p348_p8 = scmp.lt.u32.totalorder %s344_s25, %s505_s4 }
 0x1b3   :  { %p350_p9 = pnand %p348_p8, %p345_p7 }
 0x1b5   :  { %353 = shalt.err (!%p350_p9)
}
 0x1b6   :  { %226 = dma.vmem_to_hbm [thread:$0]  %s224_s2, 128, %s505_s4, [#allocation5]  }
 0x1b7   :  { %s354_s7 = scalar_lea.vmem %s234_s21, 128  ;;  %p359_p11 = scmp.lt.s32.totalorder %s234_s21, %s234_s21 }
 0x1b8   :  { %p355_p10 = scmp.ne.s32.totalorder %s234_s21, %s354_s7  ;;  %p360_p12 = scmp.lt.s32.totalorder %s354_s7, %s354_s7 }
 0x1ba   :  { %p361_p13 = por %p360_p12, %p359_p11 }
 0x1bc   :  { %p362_p0 = pnand %p361_p13, %p355_p10 }
 0x1be   :  { %365 = shalt.err (!%p362_p0)
}
 0x1bf   :  { %s366_s10 = scalar_lea.hbm %s506_s5, 128 }
 0x1c0   :  { %p367_p1 = scmp.ne.s32.totalorder %s506_s5, %s366_s10  ;;  %p370_p2 = scmp.lt.u32.totalorder %s366_s10, %s506_s5 }
 0x1c2   :  { %p372_p3 = pnand %p370_p2, %p367_p1 }
 0x1c4   :  { %375 = shalt.err (!%p372_p3)
}
 0x1c5   :  { %236 = dma.vmem_to_hbm [thread:$0]  %s234_s21, 128, %s506_s5, [#allocation10]   ;;  %v153_v50 = vpop.xlane.xlu0 %152  ;;  %vm188_vm3 = vcmask 7168  }
 0x1c6   :  { %v157_v51 = vmul.f32 %v153_v50, %v447_v0 }
 0x1c8   :  { %v184_v55 = vmul.f32 2.0, %v157_v51 }
 0x233   :  { %v174_v48 = vpop.xlane.xlu1 %173 }
 0x234   :  { %284 = vlog2.f32 %v174_v48 }
 0x237   :  { %v177_v49 = vpop.xlane.xlu1 %176 }
 0x238   :  { %286 = vlog2.f32 %v177_v49 }
 0x23b   :  { %v156_v52 = vpop.xlane.xlu1 %155 }
 0x23c   :  { %v158_v56 = vmul.f32 %v156_v52, %v447_v0 }
 0x23e   :  { %v285_v53 = vpop.eup %284  ;;  %v185_v61 = vmul.f32 2.0, %v158_v56 }
 0x23f   :  { %v179_v54 = vmul.f32 0.6931472, %v285_v53 }
 0x241   :  { %v182_v57 = vadd.f32 %v179_v54, %v162_v36 }
 0x242   :  { %v287_v58 = vpop.eup %286 }
 0x243   :  { %v181_v59 = vmul.f32 0.6931472, %v287_v58  ;;  %v186_v60 = vsub.f32 %v182_v57, %v184_v55 }
 0x245   :  { %189 = vst.msk [vmem:[%s504_s3] sm:$0xff] %vm188_vm3, %v186_v60  ;;  %v183_v62 = vadd.f32 %v181_v59, %v462_v39 }
 0x247   :  { %v187_v63 = vsub.f32 %v183_v62, %v185_v61 }
 0x249   :  { %190 = vst.msk [vmem:[%s504_s3 + $0x8] sm:$0xff] %vm188_vm3, %v187_v63 }
 0x24a   :  { %380 = dma.done.wait [#allocation5], 128  }
 0x24b   :  { %381 = vsyncadd [#allocation5], 4294967168 }
 0x24c   :  { %382 = dma.done.wait [#allocation10], 128  }
 0x24d   :  { %383 = vsyncadd [#allocation10], 4294967168 }
 0x24e   :  { %245 = vsyncpa [#allocation4], 1 }
 0x24f   :  { %246 = vsyncpa [#allocation7], 1 }
 0x250   :  { %247 = vsyncpa [#allocation5], 1 }
 0x251   :  { %248 = vsyncpa [#allocation10], 1 }

</bundles_post_ra>
